<compile_context>
chip_gen: v7x
topology: tpu7x:2x2x1
jax: 0.10.0
libtpu: 0.0.40
codegen_flags: <defaults>
</compile_context>

<pallas_src>
import functools

import jax
import jax.numpy as jnp
from jax.experimental import pallas as pl
from jax.experimental.pallas import tpu as pltpu


def _round_up(x, m):
    return ((x + m - 1) // m) * m


def _packing(d):
    """Return (d_pad, pack): feature dim padded so it packs lane-dense into 128."""
    if d >= 128:
        return _round_up(d, 128), 1
    d_pad = 1
    while d_pad < d:          # smallest power-of-two (divisor of 128) >= d
        d_pad *= 2
    return d_pad, 128 // d_pad


def _choose_tile(n_packed, tile_rows):
    """Row-tile: multiple of 8, <= tile_rows, and such that the grid has >= 2 steps
    (so v7x's two TensorCores both get work). Tiny inputs use a full-extent block."""
    if n_packed <= 8:
        return n_packed
    tile = min(tile_rows, _round_up(pl.cdiv(n_packed, 2), 8))
    return max(8, (tile // 8) * 8)


# --------------------------------------------------------------------------- kernel

def highway_kernel(x_ref, w_ref, b_ref, o_ref, *, n_layers, dp):
    # x_ref : [TILE, DP]       packed activations (lane-dense, DP multiple of 128)
    # w_ref : [L, DP, 2*DP]    fused (normal | gate) block-diagonal weights, bf16
    # b_ref : [L, 1, 2*DP]     fused (normal | gate) biases, f32
    # o_ref : [TILE, DP]
    x = x_ref[...].astype(jnp.float32)
    for i in range(n_layers):
        # One bf16 MXU GEMM per layer, f32 accumulation (normal + gate fused).
        y = jnp.dot(x.astype(jnp.bfloat16), w_ref[i],
                    preferred_element_type=jnp.float32) + b_ref[i]
        h = jnp.maximum(y[:, :dp], 0.0)          # relu    (VPU, f32)
        g = jax.nn.sigmoid(y[:, dp:])            # sigmoid (EUP slot, f32)
        x = x + g * (h - x)                      # == g*h + (1-g)*x
    o_ref[...] = x.astype(o_ref.dtype)


# ---------------------------------------------------------------- one-time weight prep

def prepare_highway_params(wn, bn, wg, bg, *, d_pad, pack):
    """Transpose, zero-pad, block-diag expand, fuse normal|gate, cast weights to bf16.
    Run ONCE (hoist out of the per-step jit) and cache the results."""
    n_layers, d, _ = wn.shape
    dp = d_pad * pack

    def prep_w(w):
        wt = jnp.swapaxes(w, 1, 2)                            # [L, D_in, D_out]
        if d_pad != d:                                        # zero-pad feature dim
            wt = jnp.pad(wt, ((0, 0), (0, d_pad - d), (0, d_pad - d)))
        eye_p = jnp.eye(pack, dtype=wt.dtype)
        return jnp.einsum("pq,lio->lpiqo", eye_p, wt).reshape(n_layers, dp, dp)

    def prep_b(b):
        if d_pad != d:
            b = jnp.pad(b, ((0, 0), (0, d_pad - d)))
        return jnp.tile(b, (1, pack))                         # [L, DP]

    w_cat = jnp.concatenate([prep_w(wn), prep_w(wg)], axis=2)            # [L, DP, 2DP]
    b_cat = jnp.concatenate([prep_b(bn), prep_b(bg)], axis=1)            # [L, 2DP]
    w_cat = w_cat.astype(jnp.bfloat16)                                   # MXU operands
    b_cat = b_cat.astype(jnp.float32).reshape(n_layers, 1, 2 * dp)       # f32 bias add
    return w_cat, b_cat


# ---------------------------------------------------------------------------- forward

def highway_forward(x, w_cat, b_cat, *, d, d_pad, pack, tile_rows=2048):
    """x: [batch, seq, d]; w_cat/b_cat from prepare_highway_params."""
    batch, seq = x.shape[0], x.shape[1]
    n_layers = w_cat.shape[0]
    dp = d_pad * pack
    n = batch * seq

    # Pack rows lane-dense.  Only pad (a) the feature dim when d doesn't divide 128
    # and (b) rows to a multiple of `pack` — NOT to a tile multiple; ragged last grid
    # block is handled by Pallas (rows are independent, extra rows are discarded).
    x2d = x.reshape(n, d)
    if d_pad != d:
        x2d = jnp.pad(x2d, ((0, 0), (0, d_pad - d)))
    pad_rows = (-n) % pack
    if pad_rows:
        x2d = jnp.pad(x2d, ((0, pad_rows), (0, 0)))
    n_packed = (n + pad_rows) // pack
    xp = x2d.reshape(n_packed, dp)

    tile = _choose_tile(n_packed, tile_rows)
    grid = pl.cdiv(n_packed, tile)

    out_itemsize = jnp.dtype(x.dtype).itemsize
    cost = pl.CostEstimate(
        flops=int(n_layers * (2 * n_packed * dp * (2 * dp) + 6 * n_packed * dp)),
        transcendentals=int(n_layers * n_packed * dp),
        bytes_accessed=int(xp.size * xp.dtype.itemsize
                           + n_packed * dp * out_itemsize
                           + w_cat.size * w_cat.dtype.itemsize
                           + b_cat.size * b_cat.dtype.itemsize),
    )

    kernel = functools.partial(highway_kernel, n_layers=n_layers, dp=dp)

    out = pl.pallas_call(
        kernel,
        out_shape=jax.ShapeDtypeStruct((n_packed, dp), x.dtype),
        grid_spec=pltpu.PrefetchScalarGridSpec(
            num_scalar_prefetch=0,
            grid=(grid,),
            in_specs=[
                # activations: tiled over rows, pipelined (ragged last block OK)
                pl.BlockSpec((tile, dp), lambda i: (i, 0)),
                # fused weights / biases: resident in VMEM across the whole grid
                pl.BlockSpec((n_layers, dp, 2 * dp), lambda i: (0, 0, 0)),
                pl.BlockSpec((n_layers, 1, 2 * dp), lambda i: (0, 0, 0)),
            ],
            out_specs=pl.BlockSpec((tile, dp), lambda i: (i, 0)),
        ),
        compiler_params=pltpu.CompilerParams(
            # rows independent -> megacore sharding on v7x, pipelining everywhere
            dimension_semantics=("parallel",),
            # footprint ~7 MiB at tile=2048; 48 MiB keeps headroom under v7x's 64 MiB
            vmem_limit_bytes=48 * 1024 * 1024,
        ),
        cost_estimate=cost,
    )(xp, w_cat, b_cat)

    out = out.reshape(n_packed * pack, d_pad)
    if pad_rows or d_pad != d:
        out = out[:n, :d]
    return out.reshape(batch, seq, d)


def highway_network(x, wn, bn, wg, bg, *, tile_rows=2048):
    """Convenience end-to-end wrapper.  In production, call prepare_highway_params
    once and reuse its outputs across steps (weight prep is pure per-call overhead)."""
    d = x.shape[-1]
    d_pad, pack = _packing(d)
    w_cat, b_cat = prepare_highway_params(wn, bn, wg, bg, d_pad=d_pad, pack=pack)
    return highway_forward(x, w_cat, b_cat, d=d, d_pad=d_pad, pack=pack,
                           tile_rows=tile_rows)


def reference_highway(x, wn, bn, wg, bg):
    """Pure-JAX f32 reference mirroring the PyTorch forward."""
    n_layers = wn.shape[0]
    for i in range(n_layers):
        h = jax.nn.relu(x @ wn[i].T + bn[i])
        g = jax.nn.sigmoid(x @ wg[i].T + bg[i])
        x = g * h + (1.0 - g) * x
    return x


if __name__ == "__main__":
    # Synthetic config: CHAR_EMBED_CNN_NUM_OUT_CHANNELS=16,
    # PRETRAINED_GLOVE_EMBED_DIM=16 -> in_size = 32; HIGHWAY_NUM_LAYERS=2.
    n_layers = 2
    d = 32
    batch, seq = 2, 8

    key = jax.random.PRNGKey(0)
    kx, kwn, kbn, kwg, kbg = jax.random.split(key, 5)

    x = jax.random.normal(kx, (batch, seq, d), dtype=jnp.float32)
    # nn.Linear-like init scale: U(-1/sqrt(d), 1/sqrt(d))
    lim = 1.0 / (d ** 0.5)
    wn = jax.random.uniform(kwn, (n_layers, d, d), jnp.float32, -lim, lim)
    bn = jax.random.uniform(kbn, (n_layers, d), jnp.float32, -lim, lim)
    wg = jax.random.uniform(kwg, (n_layers, d, d), jnp.float32, -lim, lim)
    bg = jax.random.uniform(kbg, (n_layers, d), jnp.float32, -lim, lim)

    # Weight prep done ONCE (hoisted); forward jitted with prepared params.
    d_pad, pack = _packing(d)
    w_cat, b_cat = prepare_highway_params(wn, bn, wg, bg, d_pad=d_pad, pack=pack)
    fwd = jax.jit(functools.partial(highway_forward, d=d, d_pad=d_pad, pack=pack))

    out = jax.block_until_ready(fwd(x, w_cat, b_cat))

    ref = reference_highway(x, wn, bn, wg, bg)
    assert out.shape == ref.shape == (batch, seq, d)
    # bf16 MXU operands -> validate at a looser tolerance than the f32 reference.
    assert jnp.allclose(out, ref, atol=3e-2, rtol=3e-2), (
        f"max abs err = {jnp.max(jnp.abs(out - ref))}"
    )

    print("KERNEL_OK")
</pallas_src>

<mosaic_0001>
module attributes {stable_mosaic.version = 11 : i64} {
  func.func @highway_kernel(%arg0: i32, %arg1: memref<4x128xf32, #tpu.memory_space<vmem>>, %arg2: memref<2x128x256xbf16, #tpu.memory_space<vmem>>, %arg3: memref<2x1x256xf32, #tpu.memory_space<vmem>>, %arg4: memref<4x128xf32, #tpu.memory_space<vmem>>) attributes {dimension_semantics = [#tpu.dimension_semantics<parallel>], iteration_bounds = array<i64: 1>, scalar_prefetch = 0 : i64, scratch_operands = 0 : i64, tpu.core_type = #tpu.core_type<tc>, window_params = [{transform_indices = @transform_0, window_bounds = array<i64: 4, 128>}, {pipeline_mode = #tpu.pipeline_mode<synchronous>, transform_indices = @transform_1, window_bounds = array<i64: 2, 128, 256>}, {pipeline_mode = #tpu.pipeline_mode<synchronous>, transform_indices = @transform_2, window_bounds = array<i64: 2, 1, 256>}, {transform_indices = @transform_3, window_bounds = array<i64: 4, 128>}]} {
    %c0 = arith.constant 0 : index
    %c0_0 = arith.constant 0 : index
    %0 = vector.load %arg1[%c0, %c0_0] : memref<4x128xf32, #tpu.memory_space<vmem>>, vector<4x128xf32>
    %1 = arith.truncf %0 : vector<4x128xf32> to vector<4x128xbf16>
    %c0_1 = arith.constant 0 : index
    %c0_2 = arith.constant 0 : index
    %c0_3 = arith.constant 0 : index
    %2 = vector.load %arg2[%c0_1, %c0_2, %c0_3] : memref<2x128x256xbf16, #tpu.memory_space<vmem>>, vector<1x128x256xbf16>
    %3 = vector.shape_cast %2 : vector<1x128x256xbf16> to vector<128x256xbf16>
    %cst = arith.constant dense<0.000000e+00> : vector<4x256xf32>
    %4 = tpu.matmul %1, %3, %cst {dimension_numbers = #tpu.dot_dimension_numbers<[1], [0], [0], [1], [0, 0, 1, 1], [], []>} : vector<4x128xbf16>, vector<128x256xbf16>, vector<4x256xf32> -> vector<4x256xf32>
    %c0_4 = arith.constant 0 : index
    %c0_5 = arith.constant 0 : index
    %c0_6 = arith.constant 0 : index
    %5 = vector.load %arg3[%c0_4, %c0_5, %c0_6] : memref<2x1x256xf32, #tpu.memory_space<vmem>>, vector<1x1x256xf32>
    %6 = vector.shape_cast %5 : vector<1x1x256xf32> to vector<1x256xf32>
    %7 = vector.broadcast %6 : vector<1x256xf32> to vector<4x256xf32>
    %8 = arith.addf %4, %7 : vector<4x256xf32>
    %9 = vector.extract_strided_slice %8 {offsets = [0, 0], sizes = [4, 128], strides = [1, 1]} : vector<4x256xf32> to vector<4x128xf32>
    %cst_7 = arith.constant 0.000000e+00 : f32
    %10 = vector.broadcast %cst_7 : f32 to vector<4x128xf32>
    %11 = arith.maximumf %9, %10 : vector<4x128xf32>
    %12 = vector.extract_strided_slice %8 {offsets = [0, 128], sizes = [4, 128], strides = [1, 1]} : vector<4x256xf32> to vector<4x128xf32>
    %13 = arith.negf %12 : vector<4x128xf32>
    %14 = math.exp %13 : vector<4x128xf32>
    %cst_8 = arith.constant 1.000000e+00 : f32
    %15 = vector.broadcast %cst_8 : f32 to vector<4x128xf32>
    %16 = arith.addf %15, %14 : vector<4x128xf32>
    %17 = arith.divf %15, %16 : vector<4x128xf32>
    %18 = arith.subf %11, %0 : vector<4x128xf32>
    %19 = arith.mulf %17, %18 : vector<4x128xf32>
    %20 = arith.addf %0, %19 : vector<4x128xf32>
    %21 = arith.truncf %20 : vector<4x128xf32> to vector<4x128xbf16>
    %c1 = arith.constant 1 : index
    %c0_9 = arith.constant 0 : index
    %c0_10 = arith.constant 0 : index
    %22 = vector.load %arg2[%c1, %c0_9, %c0_10] : memref<2x128x256xbf16, #tpu.memory_space<vmem>>, vector<1x128x256xbf16>
    %23 = vector.shape_cast %22 : vector<1x128x256xbf16> to vector<128x256xbf16>
    %cst_11 = arith.constant dense<0.000000e+00> : vector<4x256xf32>
    %24 = tpu.matmul %21, %23, %cst_11 {dimension_numbers = #tpu.dot_dimension_numbers<[1], [0], [0], [1], [0, 0, 1, 1], [], []>} : vector<4x128xbf16>, vector<128x256xbf16>, vector<4x256xf32> -> vector<4x256xf32>
    %c1_12 = arith.constant 1 : index
    %c0_13 = arith.constant 0 : index
    %c0_14 = arith.constant 0 : index
    %25 = vector.load %arg3[%c1_12, %c0_13, %c0_14] : memref<2x1x256xf32, #tpu.memory_space<vmem>>, vector<1x1x256xf32>
    %26 = vector.shape_cast %25 : vector<1x1x256xf32> to vector<1x256xf32>
    %27 = vector.broadcast %26 : vector<1x256xf32> to vector<4x256xf32>
    %28 = arith.addf %24, %27 : vector<4x256xf32>
    %29 = vector.extract_strided_slice %28 {offsets = [0, 0], sizes = [4, 128], strides = [1, 1]} : vector<4x256xf32> to vector<4x128xf32>
    %cst_15 = arith.constant 0.000000e+00 : f32
    %30 = vector.broadcast %cst_15 : f32 to vector<4x128xf32>
    %31 = arith.maximumf %29, %30 : vector<4x128xf32>
    %32 = vector.extract_strided_slice %28 {offsets = [0, 128], sizes = [4, 128], strides = [1, 1]} : vector<4x256xf32> to vector<4x128xf32>
    %33 = arith.negf %32 : vector<4x128xf32>
    %34 = math.exp %33 : vector<4x128xf32>
    %cst_16 = arith.constant 1.000000e+00 : f32
    %35 = vector.broadcast %cst_16 : f32 to vector<4x128xf32>
    %36 = arith.addf %35, %34 : vector<4x128xf32>
    %37 = arith.divf %35, %36 : vector<4x128xf32>
    %38 = arith.subf %31, %20 : vector<4x128xf32>
    %39 = arith.mulf %37, %38 : vector<4x128xf32>
    %40 = arith.addf %20, %39 : vector<4x128xf32>
    %c0_17 = arith.constant 0 : index
    %c0_18 = arith.constant 0 : index
    %41 = vector.load %arg4[%c0_17, %c0_18] : memref<4x128xf32, #tpu.memory_space<vmem>>, vector<4x128xf32>
    tpu.vector_store %arg4[%c0_17, %c0_18], %40 {strides = array<i32>} : memref<4x128xf32, #tpu.memory_space<vmem>>, vector<4x128xf32>,
    return
  }
  func.func @transform_0(%arg0: i32) -> (i32, i32) {
    %c0_i32 = arith.constant 0 : i32
    %c0_i32_0 = arith.constant 0 : i32
    return %arg0, %c0_i32 : i32, i32
  }
  func.func @transform_1(%arg0: i32) -> (i32, i32, i32) {
    %c0_i32 = arith.constant 0 : i32
    %c0_i32_0 = arith.constant 0 : i32
    %c0_i32_1 = arith.constant 0 : i32
    %c0_i32_2 = arith.constant 0 : i32
    return %c0_i32, %c0_i32_0, %c0_i32_1 : i32, i32, i32
  }
  func.func @transform_2(%arg0: i32) -> (i32, i32, i32) {
    %c0_i32 = arith.constant 0 : i32
    %c0_i32_0 = arith.constant 0 : i32
    %c0_i32_1 = arith.constant 0 : i32
    %c0_i32_2 = arith.constant 0 : i32
    return %c0_i32, %c0_i32_0, %c0_i32_1 : i32, i32, i32
  }
  func.func @transform_3(%arg0: i32) -> (i32, i32) {
    %c0_i32 = arith.constant 0 : i32
    %c0_i32_0 = arith.constant 0 : i32
    return %arg0, %c0_i32 : i32, i32
  }
}

</mosaic_0001>

<bundles_post_ra>
// kernel: highway_forward.1
= control target key start
LH: loop header
LB: loop body
LE: loop exit
PB: predicated region body
PF: predicated region fallthrough
CT: control target
= control target key end

     0   :  { %8 = vsyncpa [#allocation3], 0  ;;  %s477_s12 = smov [#allocation2]   ;;  %s525_s0 = inlined_call_operand.vmem [shape: f32[4,128], index: 0, kind: input, shape index: {}]   ;;  %s526_s1 = inlined_call_operand.hbm [shape: bf16[2,128,256], index: 1, kind: input, shape index: {}]   ;;  %s527_s2 = inlined_call_operand.vmem [shape: f32[2,1,256], index: 2, kind: input, shape index: {}]   ;;  %s528_s3 = inlined_call_operand.vmem [shape: f32[4,128], index: 3, kind: output, shape index: {}]  }
   0x1   :  { %s16_s13 = sshll.u32 %s477_s12, 4  ;;  %s453_s16 = scalar_lea.hbm %s526_s1, 4096  ;;  %s17_s13 = int_to_ptr.vmem [resolvable:$true] %s16_s13 }
   0x2   :  { %p454_p0 = scmp.ne.s32.totalorder %s526_s1, %s453_s16  ;;  %p457_p1 = scmp.lt.u32.totalorder %s453_s16, %s526_s1 }
   0x4   :  { %p459_p2 = pnand %p457_p1, %p454_p0 }
   0x6   :  { %462 = shalt.err (!%p459_p2)
}
   0x7   :  { %s463_s21 = scalar_lea.vmem %s17_s13, 4096  ;;  %p468_p4 = scmp.lt.s32.totalorder %s17_s13, %s17_s13 }
   0x8   :  { %p464_p3 = scmp.ne.s32.totalorder %s17_s13, %s463_s21  ;;  %p469_p5 = scmp.lt.s32.totalorder %s463_s21, %s463_s21 }
   0xa   :  { %p470_p6 = por %p469_p5, %p468_p4 }
   0xc   :  { %p471_p7 = pnand %p470_p6, %p464_p3 }
   0xe   :  { %474 = shalt.err (!%p471_p7)
}
   0xf   :  { %s478_s22 = smov 128   ;;  %s479_s23 = smov 8  }
  0x10   :  { %22 = dma.hbm_to_vmem [thread:$0]  %s526_s1, 4096, %s17_s13, [#allocation3], %s478_s22, %s478_s22, %s479_s23  }
  0x11   :  { %475 = dma.done.wait [#allocation3], 4096  }
  0x12   :  { %476 = vsyncadd [#allocation3], 4294963200  ;;  %v480_v0 = vmov 0   ;;  %v397_v1 = vld [vmem:[#allocation2 + $0x4] ss:$8 sps:$4 sm:$0xff]   ;;  %v49_v35 = vlaneseq }
  0x13   :  { %171 = vmatprep.mubr.bf16.mxu0 %v480_v0  ;;  %333 = vmatprep.mubr.bf16.mxu1 %v480_v0  ;;  %v399_v2 = vld [vmem:[#allocation2] ss:$8 sps:$4 sm:$0xff]   ;;  %v400_v3 = vld [vmem:[#allocation2 + $0x14] ss:$8 sps:$4 sm:$0xff]   ;;  %v402_v4 = vld [vmem:[#allocation2 + $0x10] ss:$8 sps:$4 sm:$0xff]  }
  0x14   :  { %139 = vmatprep.subr.bf16.mxu0 %v397_v1  ;;  %v403_v5 = vld [vmem:[#allocation2 + $0x24] ss:$8 sps:$4 sm:$0xff]   ;;  %v405_v6 = vld [vmem:[#allocation2 + $0x20] ss:$8 sps:$4 sm:$0xff]   ;;  %v406_v7 = vld [vmem:[#allocation2 + $0x34] ss:$8 sps:$4 sm:$0xff]  }
  0x15   :  { %140 = vmatpush1.bf16.msra.mxu0 %v399_v2  ;;  %v408_v8 = vld [vmem:[#allocation2 + $0x30] ss:$8 sps:$4 sm:$0xff]   ;;  %v409_v9 = vld [vmem:[#allocation2 + $0x44] ss:$8 sps:$4 sm:$0xff]   ;;  %v411_v10 = vld [vmem:[#allocation2 + $0x40] ss:$8 sps:$4 sm:$0xff]  }
  0x16   :  { %141 = vmatprep.subr.bf16.mxu0 %v400_v3  ;;  %v412_v11 = vld [vmem:[#allocation2 + $0x54] ss:$8 sps:$4 sm:$0xff]   ;;  %v414_v12 = vld [vmem:[#allocation2 + $0x50] ss:$8 sps:$4 sm:$0xff]   ;;  %v415_v13 = vld [vmem:[#allocation2 + $0x64] ss:$8 sps:$4 sm:$0xff]  }
  0x17   :  { %v417_v14 = vld [vmem:[#allocation2 + $0x60] ss:$8 sps:$4 sm:$0xff]   ;;  %v418_v15 = vld [vmem:[#allocation2 + $0x74] ss:$8 sps:$4 sm:$0xff]   ;;  %v420_v16 = vld [vmem:[#allocation2 + $0x70] ss:$8 sps:$4 sm:$0xff]  }
  0x18   :  { %v29_v17 = vld [vmem:[%s525_s0] sm:$0xf]  ;;  %v421_v19 = vld [vmem:[#allocation2 + $0x84] ss:$8 sps:$4 sm:$0xff]   ;;  %v424_v21 = vld [vmem:[#allocation2 + $0x94] ss:$8 sps:$4 sm:$0xff]  }
  0x19   :  { %142 = vmatpush1.bf16.msra.mxu0 %v402_v4  ;;  %v30_v18 = vpack.c.bf16 %v29_v17, %v29_v17  ;;  %v423_v20 = vld [vmem:[#allocation2 + $0x80] ss:$8 sps:$4 sm:$0xff]   ;;  %301 = vmatprep.subr.bf16.mxu1 %v421_v19  ;;  %v426_v22 = vld [vmem:[#allocation2 + $0x90] ss:$8 sps:$4 sm:$0xff]   ;;  %v427_v23 = vld [vmem:[#allocation2 + $0xa4] ss:$8 sps:$4 sm:$0xff]  }
  0x1a   :  { %143 = vmatprep.subr.bf16.mxu0 %v403_v5  ;;  %302 = vmatpush1.bf16.msra.mxu1 %v423_v20  ;;  %v429_v24 = vld [vmem:[#allocation2 + $0xa0] ss:$8 sps:$4 sm:$0xff]   ;;  %v430_v25 = vld [vmem:[#allocation2 + $0xb4] ss:$8 sps:$4 sm:$0xff]   ;;  %v432_v26 = vld [vmem:[#allocation2 + $0xb0] ss:$8 sps:$4 sm:$0xff]  }
  0x1b   :  { %303 = vmatprep.subr.bf16.mxu1 %v424_v21  ;;  %v433_v27 = vld [vmem:[#allocation2 + $0xc4] ss:$8 sps:$4 sm:$0xff]   ;;  %v435_v28 = vld [vmem:[#allocation2 + $0xc0] ss:$8 sps:$4 sm:$0xff]   ;;  %v436_v29 = vld [vmem:[#allocation2 + $0xd4] ss:$8 sps:$4 sm:$0xff]  }
  0x1c   :  { %v438_v30 = vld [vmem:[#allocation2 + $0xd0] ss:$8 sps:$4 sm:$0xff]   ;;  %v439_v31 = vld [vmem:[#allocation2 + $0xe4] ss:$8 sps:$4 sm:$0xff]   ;;  %v441_v32 = vld [vmem:[#allocation2 + $0xe0] ss:$8 sps:$4 sm:$0xff]  }
  0x1d   :  { %144 = vmatpush1.bf16.msra.mxu0 %v405_v6  ;;  %v442_v33 = vld [vmem:[#allocation2 + $0xf4] ss:$8 sps:$4 sm:$0xff]   ;;  %v444_v34 = vld [vmem:[#allocation2 + $0xf0] ss:$8 sps:$4 sm:$0xff]   ;;  %v50_v36 = vshrl.u32 %v49_v35, 7 }
  0x1e   :  { %145 = vmatprep.subr.bf16.mxu0 %v406_v7  ;;  %304 = vmatpush1.bf16.msra.mxu1 %v426_v22  ;;  %v47_v38 = vld [vmem:[%s527_s2] sm:$0x3]  ;;  %v375_v57 = vld [vmem:[%s527_s2 + $0x2] sm:$0x3] }
  0x1f   :  { %305 = vmatprep.subr.bf16.mxu1 %v427_v23  ;;  %v55_v37 = vsub.s32 1, %v50_v36  ;;  %v51_v46 = vsub.s32 0, %v50_v36 }
  0x21   :  { %146 = vmatpush1.bf16.msra.mxu0 %v408_v8  ;;  %v56_v39 = vrot.slane %v47_v38, %v55_v37  ;;  %v52_v48 = vrot.slane %v47_v38, %v51_v46  ;;  %v218_v58 = vrot.slane %v375_v57, %v55_v37  ;;  %v214_v2 = vrot.slane %v375_v57, %v51_v46 }
  0x22   :  { %147 = vmatprep.subr.bf16.mxu0 %v409_v9  ;;  %306 = vmatpush1.bf16.msra.mxu1 %v429_v24 }
  0x23   :  { %307 = vmatprep.subr.bf16.mxu1 %v430_v25 }
  0x25   :  { %148 = vmatpush1.bf16.msra.mxu0 %v411_v10 }
  0x26   :  { %149 = vmatprep.subr.bf16.mxu0 %v412_v11  ;;  %308 = vmatpush1.bf16.msra.mxu1 %v432_v26 }
  0x27   :  { %309 = vmatprep.subr.bf16.mxu1 %v433_v27 }
  0x29   :  { %150 = vmatpush1.bf16.msra.mxu0 %v414_v12 }
  0x2a   :  { %151 = vmatprep.subr.bf16.mxu0 %v415_v13  ;;  %310 = vmatpush1.bf16.msra.mxu1 %v435_v28 }
  0x2b   :  { %311 = vmatprep.subr.bf16.mxu1 %v436_v29 }
  0x2d   :  { %152 = vmatpush1.bf16.msra.mxu0 %v417_v14 }
  0x2e   :  { %153 = vmatprep.subr.bf16.mxu0 %v418_v15  ;;  %312 = vmatpush1.bf16.msra.mxu1 %v438_v30 }
  0x2f   :  { %313 = vmatprep.subr.bf16.mxu1 %v439_v31 }
  0x31   :  { %154 = vmatpush1.bf16.msra.mxu0 %v420_v16 }
  0x32   :  { %314 = vmatpush1.bf16.msra.mxu1 %v441_v32 }
  0x33   :  { %315 = vmatprep.subr.bf16.mxu1 %v442_v33 }
  0x34   :  { %172 = vmatmul.mubr.bf16.vlgmr.msra.gmra.mrb[0].mxu0 %v30_v18 }
  0x36   :  { %316 = vmatpush1.bf16.msra.mxu1 %v444_v34 }
 0x107   :  { %v173_v40 = vpop.f32.mrb[0].mxu0 }
 0x108   :  { %v175_v41 = vpop.f32.mrb[1].mxu0  ;;  %v174_v50 = vadd.f32 %v173_v40, %v52_v48 }
 0x109   :  { %v176_v42 = vadd.f32 %v175_v41, %v56_v39  ;;  %v177_v43 = vpop.f32.mrb[2].mxu0 }
 0x10a   :  { %v178_v44 = vpop.f32.mrb[3].mxu0  ;;  %v180_v51 = vmax.f32 %v174_v50, 0.0 }
 0x10b   :  { %v374_v45 = vmul.f32 -1.442695, %v176_v42 }
 0x10c   :  { %v187_v52 = vsub.f32 %v180_v51, %v29_v17 }
 0x10d   :  { %445 = vpow2.f32 %v374_v45 }
 0x117   :  { %v446_v47 = vpop.eup %445 }
 0x118   :  { %v184_v49 = vadd.f32 1.0, %v446_v47 }
 0x11a   :  { %447 = vrcp.f32 %v184_v49 }
 0x124   :  { %v448_v53 = vpop.eup %447 }
 0x125   :  { %v188_v54 = vmul.f32 %v448_v53, %v187_v52 }
 0x127   :  { %v189_v55 = vadd.f32 %v188_v54, %v29_v17 }
 0x129   :  { %v190_v56 = vpack.c.bf16 %v189_v55, %v189_v55 }
 0x12b   :  { %334 = vmatmul.mubr.bf16.vlgmr.msra.gmra.mrb[0].mxu1 %v190_v56 }
 0x1fe   :  { %v335_v59 = vpop.f32.mrb[0].mxu1 }
 0x1ff   :  { %v337_v60 = vpop.f32.mrb[1].mxu1  ;;  %v336_v4 = vadd.f32 %v335_v59, %v214_v2 }
 0x200   :  { %v338_v61 = vadd.f32 %v337_v60, %v218_v58  ;;  %v339_v62 = vpop.f32.mrb[2].mxu1 }
 0x201   :  { %v340_v63 = vpop.f32.mrb[3].mxu1  ;;  %v342_v5 = vmax.f32 %v336_v4, 0.0 }
 0x202   :  { %v392_v0 = vmul.f32 -1.442695, %v338_v61 }
 0x203   :  { %v349_v6 = vsub.f32 %v342_v5, %v189_v55 }
 0x204   :  { %449 = vpow2.f32 %v392_v0 }
 0x20e   :  { %v450_v1 = vpop.eup %449 }
 0x20f   :  { %v346_v3 = vadd.f32 1.0, %v450_v1 }
 0x211   :  { %451 = vrcp.f32 %v346_v3 }
 0x21b   :  { %v452_v7 = vpop.eup %451 }
 0x21c   :  { %v350_v8 = vmul.f32 %v452_v7, %v349_v6 }
 0x21e   :  { %v351_v9 = vadd.f32 %v350_v8, %v189_v55 }
 0x220   :  { %352 = vst [vmem:[%s528_s3] sm:$0xf] %v351_v9 }
 0x221   :  { %357 = vsyncpa [#allocation3], 1 }

</bundles_post_ra>
